<compile_context>
chip_gen: v5e
topology: v5e:2x2
jax: 0.10.0
libtpu: 0.0.40
codegen_flags: <defaults>
</compile_context>

<pallas_src>
import jax
import jax.numpy as jnp
from jax.experimental import pallas as pl
from jax.experimental.pallas import tpu as pltpu


def _film_kernel(x_ref, p_ref, o_ref):
    # p_ref is (tm, 2): lane 0 = gamma, lane 1 = beta. Lane-broadcast FMA on the VPU.
    g = p_ref[:, 0:1]
    b = p_ref[:, 1:2]
    o_ref[...] = (x_ref[...] * g + b).astype(o_ref.dtype)


def _round_up(a, m):
    return ((a + m - 1) // m) * m


def _vmem_budget_bytes():
    """Per-generation target for the total double-buffered VMEM footprint of one grid step."""
    try:
        kind = jax.devices()[0].device_kind.lower()
    except Exception:
        kind = ""
    if "v5" in kind:
        return 10 << 20   # v5e: scoped-VMEM default is only 16 MiB; stay well under.
    if "v6" in kind:
        return 16 << 20   # v6e: ~4 MiB x-tiles hit ~86% of HBM roofline, ample headroom.
    return 20 << 20       # v7x+: faster HBM makes the ~0.35us/step cost pricier -> bigger tiles.


def _pick_tiles(rows, hw, x_itemsize, out_itemsize, p_itemsize, budget_bytes):
    """Pick (tm, thw) so 2*(x + out + lane-padded params) tiles fit the budget."""
    LANE = 128
    VREG_BYTES = 4096
    rm_x = max(8, 32 // max(1, x_itemsize))
    rm_o = max(8, 32 // max(1, out_itemsize))
    rm_p = max(8, 32 // max(1, p_itemsize))
    row_mult = max(rm_x, rm_o, rm_p)

    def footprint(tm, thw):
        xo = tm * thw * (x_itemsize + out_itemsize)          # x-in + out tiles
        pv = (-(-tm // rm_p)) * VREG_BYTES                     # (tm, 2) block lane-pads to full vregs
        return 2 * (xo + pv)                                   # double-buffered by the pipeline

    # 1) Lane tile: full hw if even a minimal-row tile fits, else a 128-multiple under budget.
    thw = hw
    if footprint(row_mult, thw) > budget_bytes:
        per_lane = 2 * row_mult * (x_itemsize + out_itemsize)
        avail = max(0, budget_bytes - 4 * VREG_BYTES)
        thw = max(LANE, (avail // per_lane // LANE) * LANE)
        if thw >= hw:
            thw = hw

    # 2) Row tile: largest row_mult multiple under budget.
    tm = row_mult
    rows_padded = _round_up(rows, row_mult)
    while tm * 2 <= rows_padded and footprint(tm * 2, thw) <= budget_bytes:
        tm *= 2

    # 3) Never collapse the row grid to a single block when rows permit: keep >= ~4 row blocks
    #    so v7x megacore sharding and DMA/compute pipelining have work.
    if rows > row_mult:
        target = max(row_mult, _round_up(-(-rows // 4), row_mult))
        tm = max(row_mult, min(tm, target))
    if tm >= rows:
        tm = rows  # full-extent block is always legal
    return tm, thw


def film_block(x, gamma, beta, *, block_rows=None, block_hw=None):
    """x: (B, C, H, W); gamma, beta: broadcastable to (B, C) (e.g. (B, C) or (B, C, 1, 1))."""
    B, C, H, W = x.shape
    rows, hw = B * C, H * W

    # Promotion semantics match the PyTorch/JAX reference: compute in result_type(x, gamma, beta).
    param_dtype = jnp.result_type(gamma.dtype, beta.dtype)
    out_dtype = jnp.result_type(x.dtype, param_dtype)

    x2 = x.reshape(rows, hw)
    params = jnp.concatenate(
        [jnp.reshape(gamma, (rows, 1)).astype(param_dtype),
         jnp.reshape(beta, (rows, 1)).astype(param_dtype)],
        axis=1,
    )  # (rows, 2): lane 0 = gamma, lane 1 = beta

    x_isz = jnp.dtype(x.dtype).itemsize
    o_isz = jnp.dtype(out_dtype).itemsize
    p_isz = jnp.dtype(param_dtype).itemsize

    budget = _vmem_budget_bytes()
    tm, thw = _pick_tiles(rows, hw, x_isz, o_isz, p_isz, budget)
    if block_rows is not None:
        tm = block_rows
    if block_hw is not None:
        thw = block_hw

    # TODO(synk): for tiny H*W not a multiple of 128, stores are lane-masked; padding hw in the
    # wrapper costs an extra full pass over x, so we accept the masked stores here.
    grid = (pl.cdiv(rows, tm), pl.cdiv(hw, thw))

    out2 = pl.pallas_call(
        _film_kernel,
        out_shape=jax.ShapeDtypeStruct((rows, hw), out_dtype),
        grid=grid,
        in_specs=[
            pl.BlockSpec((tm, thw), lambda i, j: (i, j)),
            pl.BlockSpec((tm, 2), lambda i, j: (i, 0)),
        ],
        out_specs=pl.BlockSpec((tm, thw), lambda i, j: (i, j)),
        compiler_params=pltpu.CompilerParams(
            # Row tiles are fully independent -> megacore-shard them on v7x; the hw axis is just
            # a streaming loop ("arbitrary"). Harmless on single-TC chips.
            dimension_semantics=("parallel", "arbitrary"),
            vmem_limit_bytes=32 << 20,
        ),
        cost_estimate=pl.CostEstimate(
            flops=2 * rows * hw,
            transcendentals=0,
            bytes_accessed=rows * hw * (x_isz + o_isz) + rows * 2 * p_isz,
        ),
    )(x2, params)

    return out2.reshape(B, C, H, W)


def _reference(x, gamma, beta):
    B, C = x.shape[0], x.shape[1]
    g = jnp.reshape(gamma, (B, C, 1, 1))
    b = jnp.reshape(beta, (B, C, 1, 1))
    return g * x + b


if __name__ == "__main__":
    key = jax.random.PRNGKey(0)
    kx, kg, kb = jax.random.split(key, 3)

    B, C, H, W = 2, 4, 16, 16
    x = jax.random.normal(kx, (B, C, H, W), jnp.float32)
    gamma = jax.random.normal(kg, (B, C), jnp.float32)
    beta = jax.random.normal(kb, (B, C), jnp.float32)

    out = film_block(x, gamma, beta)
    out = jax.block_until_ready(out)

    ref = _reference(x, gamma, beta)
    assert out.shape == x.shape
    assert out.dtype == ref.dtype
    assert jnp.allclose(out, ref, atol=1e-6, rtol=1e-6), "mismatch vs reference"

    print("KERNEL_OK")
</pallas_src>

<mosaic_0001>
module attributes {stable_mosaic.version = 11 : i64} {
  func.func @_film_kernel(%arg0: i32, %arg1: i32, %arg2: memref<8x256xf32, #tpu.memory_space<vmem>>, %arg3: memref<8x2xf32, #tpu.memory_space<vmem>>, %arg4: memref<8x256xf32, #tpu.memory_space<vmem>>) attributes {dimension_semantics = [#tpu.dimension_semantics<parallel>, #tpu.dimension_semantics<arbitrary>], iteration_bounds = array<i64: 1, 1>, scalar_prefetch = 0 : i64, scratch_operands = 0 : i64, tpu.core_type = #tpu.core_type<tc>, window_params = [{transform_indices = @transform_0, window_bounds = array<i64: 8, 256>}, {transform_indices = @transform_1, window_bounds = array<i64: 8, 2>}, {transform_indices = @transform_2, window_bounds = array<i64: 8, 256>}]} {
    %c0 = arith.constant 0 : index
    %c0_0 = arith.constant 0 : index
    %0 = vector.load %arg3[%c0, %c0_0] : memref<8x2xf32, #tpu.memory_space<vmem>>, vector<8x1xf32>
    %c0_1 = arith.constant 0 : index
    %c1 = arith.constant 1 : index
    %1 = vector.load %arg3[%c0_1, %c1] : memref<8x2xf32, #tpu.memory_space<vmem>>, vector<8x1xf32>
    %c0_2 = arith.constant 0 : index
    %c0_3 = arith.constant 0 : index
    %2 = vector.load %arg2[%c0_2, %c0_3] : memref<8x256xf32, #tpu.memory_space<vmem>>, vector<8x256xf32>
    %3 = vector.broadcast %0 : vector<8x1xf32> to vector<8x256xf32>
    %4 = arith.mulf %2, %3 : vector<8x256xf32>
    %5 = vector.broadcast %1 : vector<8x1xf32> to vector<8x256xf32>
    %6 = arith.addf %4, %5 : vector<8x256xf32>
    %c0_4 = arith.constant 0 : index
    %c0_5 = arith.constant 0 : index
    %7 = vector.load %arg4[%c0_4, %c0_5] : memref<8x256xf32, #tpu.memory_space<vmem>>, vector<8x256xf32>
    tpu.vector_store %arg4[%c0_4, %c0_5], %6 {strides = array<i32>} : memref<8x256xf32, #tpu.memory_space<vmem>>, vector<8x256xf32>,
    return
  }
  func.func @transform_0(%arg0: i32, %arg1: i32) -> (i32, i32) {
    %c0_i32 = arith.constant 0 : i32
    return %arg0, %arg1 : i32, i32
  }
  func.func @transform_1(%arg0: i32, %arg1: i32) -> (i32, i32) {
    %c0_i32 = arith.constant 0 : i32
    %c0_i32_0 = arith.constant 0 : i32
    return %arg0, %c0_i32 : i32, i32
  }
  func.func @transform_2(%arg0: i32, %arg1: i32) -> (i32, i32) {
    %c0_i32 = arith.constant 0 : i32
    return %arg0, %arg1 : i32, i32
  }
}

</mosaic_0001>

<bundles_post_ra>
// kernel: tpu_custom_call.1
= control target key start
LH: loop header
LB: loop body
LE: loop exit
PB: predicated region body
PF: predicated region fallthrough
CT: control target
= control target key end

     0   :  { %7 = vsyncpa [#allocation3], 0  ;;  %s147_s0 = inlined_call_operand.hbm [shape: f32[8,256], index: 0, kind: input, shape index: {}]   ;;  %s148_s1 = inlined_call_operand.vmem [shape: f32[8,2], index: 1, kind: input, shape index: {}]   ;;  %s149_s2 = inlined_call_operand.hbm [shape: f32[8,256], index: 2, kind: output, shape index: {}]  }
   0x1   :  { %8 = vsyncpa [#allocation4], 0  ;;  %s14_s11 = sshll.u32 %s147_s0, 4  ;;  %s119_s12 = smov [#allocation2]   ;;  %s15_s11 = int_to_ptr.hbm [resolvable:$true] %s14_s11 }
   0x2   :  { %s16_s13 = sshll.u32 %s119_s12, 4  ;;  %s17_s13 = int_to_ptr.vmem [resolvable:$true] %s16_s13 }
   0x3   :  { %19 = dma.hbm_to_vmem [thread:$0]  %s15_s11, 256, %s17_s13, [#allocation3]  }
   0x4   :  { %115 = dma.done.wait [#allocation3], 256  }
   0x5   :  { %116 = vsyncadd [#allocation3], 4294967040  ;;  %v120_v0 = vmov 0   ;;  %v26_v1 = vld [vmem:[%s148_s1] sm:$0xff]  ;;  %v121_v2 = vmov 1   ;;  %v28_v5 = vld [vmem:[#allocation2 + $0x8] sm:$0xff] }
   0x6   :  { %65 = vset.pattern.permute.xlu0 %v120_v0  ;;  %v27_v4 = vld [vmem:[#allocation2] sm:$0xff]  ;;  %s122_s0 = smov [#allocation5]   ;;  %s51_s19 = sshll.u32 %s149_s2, 4  ;;  %s52_s19 = int_to_ptr.hbm [resolvable:$true] %s51_s19 }
   0x7   :  { %31 = vperm.xlu0 %65, %v26_v1   ;;  %s49_s16 = sshll.u32 %s122_s0, 4  ;;  %s50_s16 = int_to_ptr.vmem [resolvable:$true] %s49_s16 }
   0xf   :  { %66 = vset.pattern.permute.xlu0 %v121_v2 }
  0x10   :  { %37 = vperm.xlu0 %66, %v26_v1  }
  0x79   :  { %v32_v3 = vpop.permute.xlu0 %31 }
  0x7a   :  { %v34_v6 = vmul.f32 %v32_v3, %v27_v4  ;;  %v35_v7 = vmul.f32 %v32_v3, %v28_v5 }
  0x82   :  { %v38_v8 = vpop.permute.xlu0 %37 }
  0x83   :  { %v40_v9 = vadd.f32 %v38_v8, %v34_v6  ;;  %v41_v10 = vadd.f32 %v38_v8, %v35_v7 }
  0x85   :  { %42 = vst [vmem:[#allocation5] sm:$0xff] %v40_v9 }
  0x86   :  { %43 = vst [vmem:[#allocation5 + $0x8] sm:$0xff] %v41_v10 }
  0x87   :  { %54 = dma.vmem_to_hbm [thread:$0]  %s50_s16, 256, %s52_s19, [#allocation4]  }
  0x88   :  { %117 = dma.done.wait [#allocation4], 256  }
  0x89   :  { %118 = vsyncadd [#allocation4], 4294967040 }
  0x8a   :  { %59 = vsyncpa [#allocation3], 1 }
  0x8b   :  { %60 = vsyncpa [#allocation4], 1 }

</bundles_post_ra>
